<compile_context>
chip_gen: v5e
topology: v5e:2x2
jax: 0.10.0
libtpu: 0.0.40
codegen_flags: <defaults>
</compile_context>

<pallas_src>
import jax
import jax.numpy as jnp
from jax.experimental import pallas as pl
from jax.experimental.pallas import tpu as pltpu

INPUT_SIZE = 10
HIDDEN_SIZE = 4
OUTPUT_SIZE = 4

# Largest batch tile whose double-buffered x+out tiles (~192 B/lane with sublane
# padding) stay inside the 16 MiB default scoped-VMEM limit (v5e worst case).
_MAX_BATCH_TILE = 65536


def _round_up(n, m):
    return ((n + m - 1) // m) * m


def simple_nn_kernel(w1_ref, b1_ref, w2_ref, b2_ref, x_ref, o_ref):
    """w1_ref:(IN,H), b1_ref:(H,1), w2_ref:(OUT,H), b2_ref:(OUT,1) VMEM consts;
       x_ref:(IN,tb) VMEM tile; o_ref:(OUT,tb) VMEM tile."""
    x = x_ref[...]            # (IN, tb), lane-dense
    w1 = w1_ref[...]          # (IN, H)
    b1 = b1_ref[...]          # (H, 1)
    w2t = w2_ref[...]         # (OUT, H)  == W2 transposed
    b2 = b2_ref[...]          # (OUT, 1)

    # Layer 1: h_j = relu(sum_k w1[k, j] * x[k, :] + b1[j]).
    # Broadcast-multiply the full (IN, tb) block (VPU) + feature-axis reduce (XLU).
    h_rows = []
    for j in range(HIDDEN_SIZE):
        hj = jnp.sum(w1[:, j:j + 1] * x, axis=0, keepdims=True)      # (1, tb)
        h_rows.append(jnp.maximum(hj + b1[j:j + 1, :], 0.0))

    # Layer 2: out = b2 + sum_k w2t[:, k] (outer) h_k, built directly as the
    # (OUT, tb) block -- no concatenate / sublane packing before the store.
    out = b2 + w2t[:, 0:1] * h_rows[0]                               # (OUT, tb)
    for k in range(1, HIDDEN_SIZE):
        out = out + w2t[:, k:k + 1] * h_rows[k]

    o_ref[...] = out.astype(o_ref.dtype)   # single lane-dense (OUT, tb) store


def simple_nn_forward(x, w1, b1, w2, b2, *, batch_tile=32768):
    """x: (B, IN); w1: (IN, H); b1: (1, H); w2: (H, OUT); b2: (1, OUT) -> (B, OUT)."""
    batch = x.shape[0]

    # Tiny parameter blocks, resident in VMEM with a constant block index.
    w1m = w1.astype(jnp.float32)                            # (IN, H)
    b1c = b1.reshape(HIDDEN_SIZE, 1).astype(jnp.float32)    # (H, 1)
    w2t = w2.T.astype(jnp.float32)                          # (OUT, H)
    b2c = b2.reshape(OUTPUT_SIZE, 1).astype(jnp.float32)    # (OUT, 1)

    # Pad the batch only to a multiple of 128; ragged last tile handled by Pallas.
    b128 = _round_up(batch, 128)
    # Fat tiles, but (a) VMEM-safe and (b) >= 2 grid steps when batch allows
    # (so v7x's two TensorCores both get work under "parallel" semantics).
    tb = min(_round_up(pl.cdiv(b128, 2), 128), batch_tile, _MAX_BATCH_TILE)
    grid = (pl.cdiv(b128, tb),)

    # Feature-major relayout; jnp.pad avoids materializing a full zero buffer.
    # TODO(synk): if callers can supply feature-major activations, drop this
    # transpose/pad and the final .T to remove the extra XLA relayout traffic.
    xt = jnp.pad(x.astype(jnp.float32).T, ((0, 0), (0, b128 - batch)))

    out_t = pl.pallas_call(
        simple_nn_kernel,
        out_shape=jax.ShapeDtypeStruct((OUTPUT_SIZE, b128), jnp.float32),
        grid=grid,
        in_specs=[
            pl.BlockSpec((INPUT_SIZE, HIDDEN_SIZE), lambda i: (0, 0)),    # W1
            pl.BlockSpec((HIDDEN_SIZE, 1), lambda i: (0, 0)),             # b1
            pl.BlockSpec((OUTPUT_SIZE, HIDDEN_SIZE), lambda i: (0, 0)),   # W2^T
            pl.BlockSpec((OUTPUT_SIZE, 1), lambda i: (0, 0)),             # b2
            pl.BlockSpec((INPUT_SIZE, tb), lambda i: (0, i)),             # x tile
        ],
        out_specs=pl.BlockSpec((OUTPUT_SIZE, tb), lambda i: (0, i)),
        compiler_params=pltpu.CompilerParams(
            dimension_semantics=("parallel",)),
    )(w1m, b1c, w2t, b2c, xt)

    # Back to the PyTorch (batch, features) layout; drops the padded lanes.
    return out_t[:, :batch].T


def init_params(key):
    """Deterministic init mimicking nn.Linear's U(-1/sqrt(fan_in), 1/sqrt(fan_in))."""
    k1, k2, k3, k4 = jax.random.split(key, 4)
    lim1 = 1.0 / jnp.sqrt(float(INPUT_SIZE))
    lim2 = 1.0 / jnp.sqrt(float(HIDDEN_SIZE))
    # Stored transposed relative to PyTorch's (out, in) so forward is x @ W + b.
    w1 = jax.random.uniform(k1, (INPUT_SIZE, HIDDEN_SIZE), jnp.float32, -lim1, lim1)
    b1 = jax.random.uniform(k2, (1, HIDDEN_SIZE), jnp.float32, -lim1, lim1)
    w2 = jax.random.uniform(k3, (HIDDEN_SIZE, OUTPUT_SIZE), jnp.float32, -lim2, lim2)
    b2 = jax.random.uniform(k4, (1, OUTPUT_SIZE), jnp.float32, -lim2, lim2)
    return w1, b1, w2, b2


if __name__ == "__main__":
    key = jax.random.PRNGKey(0)
    k_x, k_p = jax.random.split(key)
    w1, b1, w2, b2 = init_params(k_p)

    def ref_fn(xv):
        hp = jax.lax.Precision.HIGHEST
        h = jnp.maximum(jnp.dot(xv, w1, precision=hp) + b1, 0.0)
        return jnp.dot(h, w2, precision=hp) + b2

    # 1) Small batch: single 128-lane tile, single grid step.
    x_small = jax.random.normal(k_x, (8, INPUT_SIZE), jnp.float32)
    out_small = jax.block_until_ready(simple_nn_forward(x_small, w1, b1, w2, b2))
    assert out_small.shape == (8, OUTPUT_SIZE)
    assert jnp.allclose(out_small, ref_fn(x_small), atol=1e-4, rtol=1e-4)

    # 2) Batch not a multiple of 128, multiple grid steps, ragged last block
    #    (b128=384, tb=256 -> grid=2, second block partially out of bounds).
    x_big = jax.random.normal(k_x, (300, INPUT_SIZE), jnp.float32)
    out_big = jax.block_until_ready(
        simple_nn_forward(x_big, w1, b1, w2, b2, batch_tile=256))
    assert out_big.shape == (300, OUTPUT_SIZE)
    assert jnp.allclose(out_big, ref_fn(x_big), atol=1e-4, rtol=1e-4)

    print("KERNEL_OK")
</pallas_src>

<mosaic_0001>
module attributes {stable_mosaic.version = 11 : i64} {
  func.func @simple_nn_kernel(%arg0: i32, %arg1: memref<10x4xf32, #tpu.memory_space<vmem>>, %arg2: memref<4x1xf32, #tpu.memory_space<vmem>>, %arg3: memref<4x4xf32, #tpu.memory_space<vmem>>, %arg4: memref<4x1xf32, #tpu.memory_space<vmem>>, %arg5: memref<10x128xf32, #tpu.memory_space<vmem>>, %arg6: memref<4x128xf32, #tpu.memory_space<vmem>>) attributes {dimension_semantics = [#tpu.dimension_semantics<parallel>], iteration_bounds = array<i64: 1>, scalar_prefetch = 0 : i64, scratch_operands = 0 : i64, tpu.core_type = #tpu.core_type<tc>, window_params = [{pipeline_mode = #tpu.pipeline_mode<synchronous>, transform_indices = @transform_0, window_bounds = array<i64: 10, 4>}, {pipeline_mode = #tpu.pipeline_mode<synchronous>, transform_indices = @transform_1, window_bounds = array<i64: 4, 1>}, {pipeline_mode = #tpu.pipeline_mode<synchronous>, transform_indices = @transform_2, window_bounds = array<i64: 4, 4>}, {pipeline_mode = #tpu.pipeline_mode<synchronous>, transform_indices = @transform_3, window_bounds = array<i64: 4, 1>}, {transform_indices = @transform_4, window_bounds = array<i64: 10, 128>}, {transform_indices = @transform_5, window_bounds = array<i64: 4, 128>}]} {
    %c0 = arith.constant 0 : index
    %c0_0 = arith.constant 0 : index
    %0 = vector.load %arg5[%c0, %c0_0] : memref<10x128xf32, #tpu.memory_space<vmem>>, vector<10x128xf32>
    %c0_1 = arith.constant 0 : index
    %c0_2 = arith.constant 0 : index
    %1 = vector.load %arg1[%c0_1, %c0_2] : memref<10x4xf32, #tpu.memory_space<vmem>>, vector<10x4xf32>
    %c0_3 = arith.constant 0 : index
    %c0_4 = arith.constant 0 : index
    %2 = vector.load %arg2[%c0_3, %c0_4] : memref<4x1xf32, #tpu.memory_space<vmem>>, vector<4x1xf32>
    %c0_5 = arith.constant 0 : index
    %c0_6 = arith.constant 0 : index
    %3 = vector.load %arg3[%c0_5, %c0_6] : memref<4x4xf32, #tpu.memory_space<vmem>>, vector<4x4xf32>
    %c0_7 = arith.constant 0 : index
    %c0_8 = arith.constant 0 : index
    %4 = vector.load %arg4[%c0_7, %c0_8] : memref<4x1xf32, #tpu.memory_space<vmem>>, vector<4x1xf32>
    %5 = vector.extract_strided_slice %1 {offsets = [0, 0], sizes = [10, 1], strides = [1, 1]} : vector<10x4xf32> to vector<10x1xf32>
    %6 = vector.broadcast %5 : vector<10x1xf32> to vector<10x128xf32>
    %7 = arith.mulf %6, %0 : vector<10x128xf32>
    %cst = arith.constant dense<0.000000e+00> : vector<128xf32>
    %8 = vector.multi_reduction <add>, %7, %cst [0] : vector<10x128xf32> to vector<128xf32>
    %9 = vector.shape_cast %8 : vector<128xf32> to vector<1x128xf32>
    %10 = vector.extract_strided_slice %2 {offsets = [0, 0], sizes = [1, 1], strides = [1, 1]} : vector<4x1xf32> to vector<1x1xf32>
    %11 = vector.broadcast %10 : vector<1x1xf32> to vector<1x128xf32>
    %12 = arith.addf %9, %11 : vector<1x128xf32>
    %cst_9 = arith.constant 0.000000e+00 : f32
    %13 = vector.broadcast %cst_9 : f32 to vector<1x128xf32>
    %14 = arith.maximumf %12, %13 : vector<1x128xf32>
    %15 = vector.extract_strided_slice %1 {offsets = [0, 1], sizes = [10, 1], strides = [1, 1]} : vector<10x4xf32> to vector<10x1xf32>
    %16 = vector.broadcast %15 : vector<10x1xf32> to vector<10x128xf32>
    %17 = arith.mulf %16, %0 : vector<10x128xf32>
    %cst_10 = arith.constant dense<0.000000e+00> : vector<128xf32>
    %18 = vector.multi_reduction <add>, %17, %cst_10 [0] : vector<10x128xf32> to vector<128xf32>
    %19 = vector.shape_cast %18 : vector<128xf32> to vector<1x128xf32>
    %20 = vector.extract_strided_slice %2 {offsets = [1, 0], sizes = [1, 1], strides = [1, 1]} : vector<4x1xf32> to vector<1x1xf32>
    %21 = vector.broadcast %20 : vector<1x1xf32> to vector<1x128xf32>
    %22 = arith.addf %19, %21 : vector<1x128xf32>
    %cst_11 = arith.constant 0.000000e+00 : f32
    %23 = vector.broadcast %cst_11 : f32 to vector<1x128xf32>
    %24 = arith.maximumf %22, %23 : vector<1x128xf32>
    %25 = vector.extract_strided_slice %1 {offsets = [0, 2], sizes = [10, 1], strides = [1, 1]} : vector<10x4xf32> to vector<10x1xf32>
    %26 = vector.broadcast %25 : vector<10x1xf32> to vector<10x128xf32>
    %27 = arith.mulf %26, %0 : vector<10x128xf32>
    %cst_12 = arith.constant dense<0.000000e+00> : vector<128xf32>
    %28 = vector.multi_reduction <add>, %27, %cst_12 [0] : vector<10x128xf32> to vector<128xf32>
    %29 = vector.shape_cast %28 : vector<128xf32> to vector<1x128xf32>
    %30 = vector.extract_strided_slice %2 {offsets = [2, 0], sizes = [1, 1], strides = [1, 1]} : vector<4x1xf32> to vector<1x1xf32>
    %31 = vector.broadcast %30 : vector<1x1xf32> to vector<1x128xf32>
    %32 = arith.addf %29, %31 : vector<1x128xf32>
    %cst_13 = arith.constant 0.000000e+00 : f32
    %33 = vector.broadcast %cst_13 : f32 to vector<1x128xf32>
    %34 = arith.maximumf %32, %33 : vector<1x128xf32>
    %35 = vector.extract_strided_slice %1 {offsets = [0, 3], sizes = [10, 1], strides = [1, 1]} : vector<10x4xf32> to vector<10x1xf32>
    %36 = vector.broadcast %35 : vector<10x1xf32> to vector<10x128xf32>
    %37 = arith.mulf %36, %0 : vector<10x128xf32>
    %cst_14 = arith.constant dense<0.000000e+00> : vector<128xf32>
    %38 = vector.multi_reduction <add>, %37, %cst_14 [0] : vector<10x128xf32> to vector<128xf32>
    %39 = vector.shape_cast %38 : vector<128xf32> to vector<1x128xf32>
    %40 = vector.extract_strided_slice %2 {offsets = [3, 0], sizes = [1, 1], strides = [1, 1]} : vector<4x1xf32> to vector<1x1xf32>
    %41 = vector.broadcast %40 : vector<1x1xf32> to vector<1x128xf32>
    %42 = arith.addf %39, %41 : vector<1x128xf32>
    %cst_15 = arith.constant 0.000000e+00 : f32
    %43 = vector.broadcast %cst_15 : f32 to vector<1x128xf32>
    %44 = arith.maximumf %42, %43 : vector<1x128xf32>
    %45 = vector.extract_strided_slice %3 {offsets = [0, 0], sizes = [4, 1], strides = [1, 1]} : vector<4x4xf32> to vector<4x1xf32>
    %46 = vector.broadcast %45 : vector<4x1xf32> to vector<4x128xf32>
    %47 = vector.broadcast %14 : vector<1x128xf32> to vector<4x128xf32>
    %48 = arith.mulf %46, %47 : vector<4x128xf32>
    %49 = vector.broadcast %4 : vector<4x1xf32> to vector<4x128xf32>
    %50 = arith.addf %49, %48 : vector<4x128xf32>
    %51 = vector.extract_strided_slice %3 {offsets = [0, 1], sizes = [4, 1], strides = [1, 1]} : vector<4x4xf32> to vector<4x1xf32>
    %52 = vector.broadcast %51 : vector<4x1xf32> to vector<4x128xf32>
    %53 = vector.broadcast %24 : vector<1x128xf32> to vector<4x128xf32>
    %54 = arith.mulf %52, %53 : vector<4x128xf32>
    %55 = arith.addf %50, %54 : vector<4x128xf32>
    %56 = vector.extract_strided_slice %3 {offsets = [0, 2], sizes = [4, 1], strides = [1, 1]} : vector<4x4xf32> to vector<4x1xf32>
    %57 = vector.broadcast %56 : vector<4x1xf32> to vector<4x128xf32>
    %58 = vector.broadcast %34 : vector<1x128xf32> to vector<4x128xf32>
    %59 = arith.mulf %57, %58 : vector<4x128xf32>
    %60 = arith.addf %55, %59 : vector<4x128xf32>
    %61 = vector.extract_strided_slice %3 {offsets = [0, 3], sizes = [4, 1], strides = [1, 1]} : vector<4x4xf32> to vector<4x1xf32>
    %62 = vector.broadcast %61 : vector<4x1xf32> to vector<4x128xf32>
    %63 = vector.broadcast %44 : vector<1x128xf32> to vector<4x128xf32>
    %64 = arith.mulf %62, %63 : vector<4x128xf32>
    %65 = arith.addf %60, %64 : vector<4x128xf32>
    %c0_16 = arith.constant 0 : index
    %c0_17 = arith.constant 0 : index
    %66 = vector.load %arg6[%c0_16, %c0_17] : memref<4x128xf32, #tpu.memory_space<vmem>>, vector<4x128xf32>
    tpu.vector_store %arg6[%c0_16, %c0_17], %65 {strides = array<i32>} : memref<4x128xf32, #tpu.memory_space<vmem>>, vector<4x128xf32>,
    return
  }
  func.func @transform_0(%arg0: i32) -> (i32, i32) {
    %c0_i32 = arith.constant 0 : i32
    %c0_i32_0 = arith.constant 0 : i32
    %c0_i32_1 = arith.constant 0 : i32
    return %c0_i32, %c0_i32_0 : i32, i32
  }
  func.func @transform_1(%arg0: i32) -> (i32, i32) {
    %c0_i32 = arith.constant 0 : i32
    %c0_i32_0 = arith.constant 0 : i32
    %c0_i32_1 = arith.constant 0 : i32
    return %c0_i32, %c0_i32_0 : i32, i32
  }
  func.func @transform_2(%arg0: i32) -> (i32, i32) {
    %c0_i32 = arith.constant 0 : i32
    %c0_i32_0 = arith.constant 0 : i32
    %c0_i32_1 = arith.constant 0 : i32
    return %c0_i32, %c0_i32_0 : i32, i32
  }
  func.func @transform_3(%arg0: i32) -> (i32, i32) {
    %c0_i32 = arith.constant 0 : i32
    %c0_i32_0 = arith.constant 0 : i32
    %c0_i32_1 = arith.constant 0 : i32
    return %c0_i32, %c0_i32_0 : i32, i32
  }
  func.func @transform_4(%arg0: i32) -> (i32, i32) {
    %c0_i32 = arith.constant 0 : i32
    %c0_i32_0 = arith.constant 0 : i32
    return %c0_i32, %arg0 : i32, i32
  }
  func.func @transform_5(%arg0: i32) -> (i32, i32) {
    %c0_i32 = arith.constant 0 : i32
    %c0_i32_0 = arith.constant 0 : i32
    return %c0_i32, %arg0 : i32, i32
  }
}

</mosaic_0001>

<bundles_post_ra>
// kernel: tpu_custom_call.1
= control target key start
LH: loop header
LB: loop body
LE: loop exit
PB: predicated region body
PF: predicated region fallthrough
CT: control target
= control target key end

     0   :  { %v212_v2 = vmov 0   ;;  %s281_s0 = inlined_call_operand.vmem [shape: f32[10,4], index: 0, kind: input, shape index: {}]   ;;  %s282_s1 = inlined_call_operand.vmem [shape: f32[4,1], index: 1, kind: input, shape index: {}]   ;;  %s283_s2 = inlined_call_operand.vmem [shape: f32[4,4], index: 2, kind: input, shape index: {}]   ;;  %s284_s3 = inlined_call_operand.vmem [shape: f32[4,1], index: 3, kind: input, shape index: {}]   ;;  %s285_s4 = inlined_call_operand.vmem [shape: f32[10,128], index: 4, kind: input, shape index: {}]   ;;  %s286_s5 = inlined_call_operand.hbm [shape: f32[4,128], index: 5, kind: output, shape index: {}]  }
   0x1   :  { %v25_v0 = vld [vmem:[%s282_s1] sm:$0xf]  ;;  %173 = vset.pattern.permute.xlu1 %v212_v2  ;;  %172 = vset.pattern.permute.xlu0 %v212_v2 }
   0x2   :  { %v23_v1 = vld [vmem:[%s281_s0] sm:$0xff]  ;;  %51 = vperm.xlu1 %173, %v25_v0  }
   0x3   :  { %30 = vperm.xlu0 %172, %v23_v1  }
   0x4   :  { %10 = vsyncpa [#allocation3], 0  ;;  %v213_v3 = vmov 1   ;;  %v24_v4 = vld [vmem:[%s281_s0 + $0x8] sm:$0x3]  ;;  %v214_v5 = vmov 2  }
   0x5   :  { %175 = vset.pattern.permute.xlu2 %v213_v3  ;;  %v215_v6 = vmov 3   ;;  %v26_v7 = vld [vmem:[%s283_s2] sm:$0xf]  ;;  %v22_v13 = vld [vmem:[%s285_s4 + $0x8] sm:$0x3]  ;;  %vm40_vm0 = vcmask 1041408  }
   0x6   :  { %57 = vperm.xlu2 %175, %v23_v1   ;;  %v27_v8 = vld [vmem:[%s284_s3] sm:$0xf]  ;;  %s216_s3 = smov [#allocation2]   ;;  %s158_s6 = sshll.u32 %s286_s5, 4  ;;  %s159_s6 = int_to_ptr.hbm [resolvable:$true] %s158_s6 }
   0x7   :  { %v21_v14 = vld [vmem:[%s285_s4] sm:$0xff]  ;;  %s156_s4 = sshll.u32 %s216_s3, 4  ;;  %s157_s4 = int_to_ptr.vmem [resolvable:$true] %s156_s4 }
   0xa   :  { %174 = vset.pattern.permute.xlu1 %v213_v3 }
   0xb   :  { %35 = vperm.xlu0 %172, %v24_v4   ;;  %61 = vperm.xlu1 %174, %v24_v4  }
   0xe   :  { %176 = vset.pattern.permute.xlu2 %v214_v5 }
   0xf   :  { %81 = vperm.xlu2 %176, %v24_v4  }
  0x13   :  { %177 = vset.pattern.permute.xlu0 %v214_v5  ;;  %178 = vset.pattern.permute.xlu1 %v215_v6 }
  0x14   :  { %77 = vperm.xlu0 %177, %v23_v1   ;;  %101 = vperm.xlu1 %178, %v24_v4  }
  0x17   :  { %179 = vset.pattern.permute.xlu2 %v215_v6 }
  0x18   :  { %97 = vperm.xlu2 %179, %v23_v1  }
  0x1c   :  { %182 = vset.pattern.permute.xlu0 %v213_v3  ;;  %180 = vset.pattern.permute.xlu1 %v212_v2 }
  0x1d   :  { %130 = vperm.xlu0 %182, %v26_v7   ;;  %118 = vperm.xlu1 %180, %v26_v7  }
  0x20   :  { %181 = vset.pattern.permute.xlu2 %v212_v2 }
  0x21   :  { %125 = vperm.xlu2 %181, %v27_v8  }
  0x25   :  { %185 = vset.pattern.permute.xlu0 %v215_v6  ;;  %183 = vset.pattern.permute.xlu1 %v214_v5 }
  0x26   :  { %137 = vperm.xlu1 %183, %v26_v7  }
  0x29   :  { %184 = vset.pattern.permute.xlu2 %v215_v6 }
  0x2a   :  { %144 = vperm.xlu2 %184, %v26_v7  }
  0x60   :  { %v58_v9 = vpop.permute.xlu2 %57 }
  0x61   :  { %v64_v20 = vmul.f32 %v58_v9, %v21_v14 }
  0x69   :  { %v82_v12 = vpop.permute.xlu2 %81 }
  0x6a   :  { %v85_v27 = vmul.f32 %v82_v12, %v22_v13 }
  0x6c   :  { %v86_v37 = vsel %vm40_vm0, %v85_v27, 0.0 }
  0x72   :  { %v98_v28 = vpop.permute.xlu2 %97 }
  0x73   :  { %v104_v35 = vmul.f32 %v98_v28, %v21_v14 }
  0x74   :  { %v262_v10 = vpop.permute.xlu1 %51 }
  0x75   :  { %v31_v11 = vpop.permute.xlu0 %30 }
  0x76   :  { %v38_v18 = vmul.f32 %v31_v11, %v21_v14 }
  0x7b   :  { %v126_v59 = vpop.permute.xlu2 %125 }
  0x7d   :  { %v36_v15 = vpop.permute.xlu0 %35  ;;  %v62_v17 = vpop.permute.xlu1 %61 }
  0x7e   :  { %v39_v16 = vmul.f32 %v36_v15, %v22_v13  ;;  %v65_v19 = vmul.f32 %v62_v17, %v22_v13 }
  0x80   :  { %v41_v21 = vsel %vm40_vm0, %v39_v16, 0.0  ;;  %v66_v23 = vsel %vm40_vm0, %v65_v19, 0.0 }
  0x81   :  { %v42_v22 = vadd.f32 %v41_v21, %v38_v18  ;;  %v67_v24 = vadd.f32 %v66_v23, %v64_v20 }
  0x83   :  { %v43_v25 = vrot.slane %v42_v22, 4  ;;  %v68_v26 = vrot.slane %v67_v24, 4 }
  0x84   :  { %v145_v15 = vpop.permute.xlu2 %144 }
  0x85   :  { %v44_v29 = vadd.f32 %v43_v25, %v42_v22  ;;  %v69_v30 = vadd.f32 %v68_v26, %v67_v24 }
  0x86   :  { %v78_v31 = vpop.permute.xlu0 %77  ;;  %v102_v34 = vpop.permute.xlu1 %101 }
  0x87   :  { %v45_v32 = vrot.slane %v44_v29, 2  ;;  %v84_v33 = vmul.f32 %v78_v31, %v21_v14  ;;  %v70_v36 = vrot.slane %v69_v30, 2  ;;  %v105_v38 = vmul.f32 %v102_v34, %v22_v13 }
  0x89   :  { %v87_v39 = vadd.f32 %v86_v37, %v84_v33  ;;  %v46_v40 = vadd.f32 %v45_v32, %v44_v29  ;;  %v106_v41 = vsel %vm40_vm0, %v105_v38, 0.0  ;;  %v71_v42 = vadd.f32 %v70_v36, %v69_v30 }
  0x8a   :  { %v107_v44 = vadd.f32 %v106_v41, %v104_v35 }
  0x8b   :  { %v88_v43 = vrot.slane %v87_v39, 4  ;;  %v47_v45 = vrot.slane %v46_v40, 1  ;;  %v72_v46 = vrot.slane %v71_v42, 1 }
  0x8c   :  { %v108_v48 = vrot.slane %v107_v44, 4 }
  0x8d   :  { %v89_v47 = vadd.f32 %v88_v43, %v87_v39  ;;  %v48_v49 = vadd.f32 %v47_v45, %v46_v40  ;;  %v73_v50 = vadd.f32 %v72_v46, %v71_v42 }
  0x8e   :  { %v109_v52 = vadd.f32 %v108_v48, %v107_v44 }
  0x8f   :  { %v90_v51 = vrot.slane %v89_v47, 2  ;;  %v54_v53 = vadd.f32 %v262_v10, %v48_v49  ;;  %v119_v54 = vpop.permute.xlu1 %118  ;;  %v74_v55 = vadd.f32 %v73_v50, %v262_v10  ;;  %v131_v4 = vpop.permute.xlu0 %130 }
  0x90   :  { %v110_v57 = vrot.slane %v109_v52, 2 }
  0x91   :  { %v91_v56 = vadd.f32 %v90_v51, %v89_v47  ;;  %v55_v58 = vmax.f32 %v54_v53, 0.0  ;;  %v75_v60 = vmax.f32 %v74_v55, 0.0 }
  0x92   :  { %v111_v61 = vadd.f32 %v110_v57, %v109_v52 }
  0x93   :  { %v121_v62 = vperm.slane %v55_v58, 0  ;;  %v92_v63 = vrot.slane %v91_v56, 1  ;;  %v133_v1 = vperm.slane %v75_v60, 1 }
  0x94   :  { %v112_v3 = vrot.slane %v111_v61, 1 }
  0x95   :  { %v122_v0 = vmul.f32 %v121_v62, %v119_v54  ;;  %v93_v2 = vadd.f32 %v92_v63, %v91_v56  ;;  %v134_v8 = vmul.f32 %v133_v1, %v131_v4 }
  0x96   :  { %v113_v6 = vadd.f32 %v112_v3, %v111_v61 }
  0x97   :  { %v94_v5 = vadd.f32 %v93_v2, %v262_v10  ;;  %v128_v7 = vadd.f32 %v126_v59, %v122_v0 }
  0x98   :  { %v114_v11 = vadd.f32 %v113_v6, %v262_v10  ;;  %v138_v12 = vpop.permute.xlu1 %137 }
  0x99   :  { %v95_v9 = vmax.f32 %v94_v5, 0.0  ;;  %v135_v16 = vadd.f32 %v134_v8, %v128_v7 }
  0x9a   :  { %v115_v14 = vmax.f32 %v114_v11, 0.0 }
  0x9b   :  { %v140_v13 = vperm.slane %v95_v9, 2 }
  0x9c   :  { %v147_v18 = vperm.slane %v115_v14, 3 }
  0x9d   :  { %v141_v17 = vmul.f32 %v140_v13, %v138_v12 }
  0x9e   :  { %v148_v20 = vmul.f32 %v147_v18, %v145_v15 }
  0x9f   :  { %v142_v19 = vadd.f32 %v141_v17, %v135_v16 }
  0xa1   :  { %v149_v21 = vadd.f32 %v148_v20, %v142_v19 }
  0xa3   :  { %150 = vst [vmem:[#allocation2] sm:$0xf] %v149_v21 }
  0xa4   :  { %161 = dma.vmem_to_hbm [thread:$0]  %s157_s4, 64, %s159_s6, [#allocation3]  }
  0xa5   :  { %210 = dma.done.wait [#allocation3], 64  }
  0xa6   :  { %211 = vsyncadd [#allocation3], 4294967232 }
  0xa7   :  { %166 = vsyncpa [#allocation3], 1 }

</bundles_post_ra>
